<compile_context>
chip_gen: v5e
topology: v5e:2x2
jax: 0.10.0
libtpu: 0.0.40
codegen_flags: <defaults>
</compile_context>

<pallas_src>
from functools import partial

import jax
import jax.numpy as jnp
from jax.experimental import pallas as pl
from jax.experimental.pallas import tpu as pltpu

LANE = 128  # lane-dense padding granule for the last (feature) dims


def _round_up(x, m):
    return (x + m - 1) // m * m


def _pad2d(x, rows, cols):
    r, c = x.shape
    return jnp.pad(x, ((0, rows - r), (0, cols - c)))


# ---------------------------------------------------------------------------
# Kernels
# ---------------------------------------------------------------------------
def _fused_ctx_kernel(zc_ref, wc_ref, bc_ref, wo_ref, bo_ref, z_ref, o_ref):
    """z = [z|ctx|pad] @ Wc + bc ; out = relu(z @ Wo + bo).  One batch tile."""
    # Context projection: one MXU dot on the concatenated (lane-padded) input.
    z = jnp.dot(zc_ref[...], wc_ref[...], preferred_element_type=jnp.float32)
    z = z + bc_ref[...]                       # f32 bias add (resident block)
    z_ref[...] = z.astype(z_ref.dtype)        # first output (lane-dense)
    # Output projection + ReLU, fused — no HBM round trip of z.
    out = jnp.dot(z.astype(wo_ref.dtype), wo_ref[...],
                  preferred_element_type=jnp.float32)
    o_ref[...] = jnp.maximum(out + bo_ref[...], 0.0).astype(o_ref.dtype)


def _relu_linear_kernel(x_ref, wo_ref, bo_ref, o_ref):
    """out = relu(x @ Wo + bo) — used when no context is supplied."""
    out = jnp.dot(x_ref[...], wo_ref[...], preferred_element_type=jnp.float32)
    o_ref[...] = jnp.maximum(out + bo_ref[...], 0.0).astype(o_ref.dtype)


# ---------------------------------------------------------------------------
# Pallas wrappers
# ---------------------------------------------------------------------------
_COMPILER_PARAMS = pltpu.CompilerParams(
    dimension_semantics=("parallel",),        # batch axis -> both TCs on v7x
    vmem_limit_bytes=32 * 1024 * 1024,        # explicit budget (safe on v5e/v6e/v7x)
)


def _batch_tiling(batch, sublane):
    tile_b = min(512, _round_up(batch, sublane))
    b_pad = _round_up(batch, tile_b)
    return tile_b, b_pad


def _fused_call(zc_p, w_ctx, b_ctx, w_out, b_out, tile_b, out_dtype):
    b_pad, k_pad = zc_p.shape
    din_pad = w_ctx.shape[1]
    dout_pad = w_out.shape[1]
    act = lambda cols: pl.BlockSpec((tile_b, cols), lambda i: (i, 0))
    res = lambda shape: pl.BlockSpec(shape, lambda i: (0, 0))   # resident weights/bias
    z_p, out_p = pl.pallas_call(
        _fused_ctx_kernel,
        out_shape=(jax.ShapeDtypeStruct((b_pad, din_pad), out_dtype),
                   jax.ShapeDtypeStruct((b_pad, dout_pad), out_dtype)),
        grid=(b_pad // tile_b,),
        in_specs=[act(k_pad), res(w_ctx.shape), res(b_ctx.shape),
                  res(w_out.shape), res(b_out.shape)],
        out_specs=(act(din_pad), act(dout_pad)),
        compiler_params=_COMPILER_PARAMS,
    )(zc_p, w_ctx, b_ctx, w_out, b_out)
    return z_p, out_p


def _relu_linear_call(x_p, w_out, b_out, tile_b, out_dtype):
    b_pad, din_pad = x_p.shape
    dout_pad = w_out.shape[1]
    act = lambda cols: pl.BlockSpec((tile_b, cols), lambda i: (i, 0))
    res = lambda shape: pl.BlockSpec(shape, lambda i: (0, 0))
    return pl.pallas_call(
        _relu_linear_kernel,
        out_shape=jax.ShapeDtypeStruct((b_pad, dout_pad), out_dtype),
        grid=(b_pad // tile_b,),
        in_specs=[act(din_pad), res(w_out.shape), res(b_out.shape)],
        out_specs=act(dout_pad),
        compiler_params=_COMPILER_PARAMS,
    )(x_p, w_out, b_out)


# ---------------------------------------------------------------------------
# Jitted end-to-end forward paths (concat/pad/slice fused with the kernel call)
# ---------------------------------------------------------------------------
@partial(jax.jit, static_argnames=("input_dim", "output_dim", "k_pad", "compute_dtype"))
def _forward_with_context(z, context, w_ctx, b_ctx, w_out, b_out, *,
                          input_dim, output_dim, k_pad, compute_dtype):
    batch = z.shape[0]
    sublane = 8 * (4 // jnp.dtype(compute_dtype).itemsize)   # 8 f32 / 16 bf16
    tile_b, b_pad = _batch_tiling(batch, sublane)
    # One lane-dense buffer holding [z | context | 0-pad] -> single MXU dot.
    zc = jnp.concatenate([z, context], axis=1).astype(compute_dtype)
    zc_p = _pad2d(zc, b_pad, k_pad)
    z_p, out_p = _fused_call(zc_p, w_ctx, b_ctx, w_out, b_out, tile_b, z.dtype)
    return out_p[:batch, :output_dim], z_p[:batch, :input_dim]


@partial(jax.jit, static_argnames=("output_dim", "din_pad", "compute_dtype"))
def _forward_no_context(z, w_out, b_out, *, output_dim, din_pad, compute_dtype):
    batch = z.shape[0]
    sublane = 8 * (4 // jnp.dtype(compute_dtype).itemsize)
    tile_b, b_pad = _batch_tiling(batch, sublane)
    x_p = _pad2d(z.astype(compute_dtype), b_pad, din_pad)
    out_p = _relu_linear_call(x_p, w_out, b_out, tile_b, z.dtype)
    return out_p[:batch, :output_dim]


# ---------------------------------------------------------------------------
# Condition module (parameters + forward)
# ---------------------------------------------------------------------------
class Condition:
    def __init__(self, input_dim, output_dim, semantic_dim=0, *, key,
                 param_dtype=jnp.float32, compute_dtype=jnp.bfloat16):
        self.input_dim = input_dim
        self.output_dim = output_dim
        self.semantic_dim = semantic_dim
        self.param_dtype = param_dtype
        self.compute_dtype = compute_dtype

        ctx_in = semantic_dim + input_dim
        # Lane-dense padded feature dims (padded ONCE at init).
        self.k_pad = _round_up(ctx_in, LANE)
        self.din_pad = _round_up(input_dim, LANE)
        self.dout_pad = _round_up(output_dim, LANE)

        k1, k2, k3, k4 = jax.random.split(key, 4)

        # context_projection: Linear(semantic_dim + input_dim -> input_dim)
        ctx_scale = 1.0 / jnp.sqrt(jnp.float32(ctx_in))
        w_ctx = jax.random.uniform(k1, (ctx_in, input_dim), param_dtype, -ctx_scale, ctx_scale)
        b_ctx = jax.random.uniform(k2, (1, input_dim), param_dtype, -ctx_scale, ctx_scale)

        # output_projection: Linear(input_dim -> output_dim) (+ ReLU inside kernel)
        out_scale = 1.0 / jnp.sqrt(jnp.float32(input_dim))
        w_out = jax.random.uniform(k3, (input_dim, output_dim), param_dtype, -out_scale, out_scale)
        b_out = jax.random.uniform(k4, (1, output_dim), param_dtype, -out_scale, out_scale)

        # Unpadded f32 copies (reference / diagnostics).
        self.w_ctx_raw, self.b_ctx_raw = w_ctx, b_ctx
        self.w_out_raw, self.b_out_raw = w_out, b_out

        # Padded, MXU-dtype weights; zero padding keeps the math exact.
        self.w_ctx = _pad2d(w_ctx, self.k_pad, self.din_pad).astype(compute_dtype)
        self.b_ctx = _pad2d(b_ctx, 1, self.din_pad).astype(jnp.float32)
        self.w_out = _pad2d(w_out, self.din_pad, self.dout_pad).astype(compute_dtype)
        self.b_out = _pad2d(b_out, 1, self.dout_pad).astype(jnp.float32)

    def __call__(self, z, context=None):
        if self.semantic_dim > 0 and context is not None:
            return _forward_with_context(
                z, context, self.w_ctx, self.b_ctx, self.w_out, self.b_out,
                input_dim=self.input_dim, output_dim=self.output_dim,
                k_pad=self.k_pad, compute_dtype=self.compute_dtype)

        # No context: z passes through unchanged; only ReLU(Linear(z)).
        # TODO(synk): PyTorch would raise on a shape mismatch if semantic_dim>0 but
        # context is None; here we mirror the original module's silent skip.
        out = _forward_no_context(
            z, self.w_out, self.b_out,
            output_dim=self.output_dim, din_pad=self.din_pad,
            compute_dtype=self.compute_dtype)
        return out, z


# ---------------------------------------------------------------------------
# Demo / smoke test
# ---------------------------------------------------------------------------
if __name__ == "__main__":
    batch, input_dim, output_dim, semantic_dim = 8, 32, 64, 16

    key = jax.random.PRNGKey(0)
    k_params, k_z, k_c = jax.random.split(key, 3)

    module = Condition(input_dim, output_dim, semantic_dim, key=k_params)

    z = jax.random.normal(k_z, (batch, input_dim), jnp.float32)
    context = jax.random.normal(k_c, (batch, semantic_dim), jnp.float32)

    out, z_proj = module(z, context)
    jax.block_until_ready((out, z_proj))

    # Plain-JAX reference with the same bf16-operand / f32-accumulate math.
    cd = module.compute_dtype
    zc = jnp.concatenate([z, context], axis=1)
    z_ref = jnp.dot(zc.astype(cd), module.w_ctx_raw.astype(cd),
                    preferred_element_type=jnp.float32) + module.b_ctx_raw
    out_ref = jnp.maximum(
        jnp.dot(z_ref.astype(cd), module.w_out_raw.astype(cd),
                preferred_element_type=jnp.float32) + module.b_out_raw, 0.0)

    assert out.shape == (batch, output_dim) and z_proj.shape == (batch, input_dim)
    assert jnp.allclose(z_proj, z_ref, atol=1e-2, rtol=1e-2), "context projection mismatch"
    assert jnp.allclose(out, out_ref, atol=1e-2, rtol=1e-2), "output projection mismatch"

    # No-context path (z is returned untouched).
    out2, z2 = module(z, None)
    jax.block_until_ready((out2, z2))
    out2_ref = jnp.maximum(
        jnp.dot(z.astype(cd), module.w_out_raw.astype(cd),
                preferred_element_type=jnp.float32) + module.b_out_raw, 0.0)
    assert jnp.allclose(out2, out2_ref, atol=1e-2, rtol=1e-2), "no-context path mismatch"
    assert jnp.array_equal(z2, z), "pass-through z mismatch"

    print("KERNEL_OK")
</pallas_src>

<mosaic_0001>
module attributes {stable_mosaic.version = 11 : i64} {
  func.func @_fused_ctx_kernel(%arg0: i32, %arg1: memref<16x128xbf16, #tpu.memory_space<vmem>>, %arg2: memref<128x128xbf16, #tpu.memory_space<vmem>>, %arg3: memref<1x128xf32, #tpu.memory_space<vmem>>, %arg4: memref<128x128xbf16, #tpu.memory_space<vmem>>, %arg5: memref<1x128xf32, #tpu.memory_space<vmem>>, %arg6: memref<16x128xf32, #tpu.memory_space<vmem>>, %arg7: memref<16x128xf32, #tpu.memory_space<vmem>>) attributes {dimension_semantics = [#tpu.dimension_semantics<parallel>], iteration_bounds = array<i64: 1>, scalar_prefetch = 0 : i64, scratch_operands = 0 : i64, tpu.core_type = #tpu.core_type<tc>, window_params = [{transform_indices = @transform_0, window_bounds = array<i64: 16, 128>}, {pipeline_mode = #tpu.pipeline_mode<synchronous>, transform_indices = @transform_1, window_bounds = array<i64: 128, 128>}, {pipeline_mode = #tpu.pipeline_mode<synchronous>, transform_indices = @transform_2, window_bounds = array<i64: 1, 128>}, {pipeline_mode = #tpu.pipeline_mode<synchronous>, transform_indices = @transform_3, window_bounds = array<i64: 128, 128>}, {pipeline_mode = #tpu.pipeline_mode<synchronous>, transform_indices = @transform_4, window_bounds = array<i64: 1, 128>}, {transform_indices = @transform_5, window_bounds = array<i64: 16, 128>}, {transform_indices = @transform_6, window_bounds = array<i64: 16, 128>}]} {
    %c0 = arith.constant 0 : index
    %c0_0 = arith.constant 0 : index
    %0 = vector.load %arg1[%c0, %c0_0] : memref<16x128xbf16, #tpu.memory_space<vmem>>, vector<16x128xbf16>
    %c0_1 = arith.constant 0 : index
    %c0_2 = arith.constant 0 : index
    %1 = vector.load %arg2[%c0_1, %c0_2] : memref<128x128xbf16, #tpu.memory_space<vmem>>, vector<128x128xbf16>
    %cst = arith.constant dense<0.000000e+00> : vector<16x128xf32>
    %2 = tpu.matmul %0, %1, %cst {dimension_numbers = #tpu.dot_dimension_numbers<[1], [0], [0], [1], [0, 0, 1, 1], [], []>} : vector<16x128xbf16>, vector<128x128xbf16>, vector<16x128xf32> -> vector<16x128xf32>
    %c0_3 = arith.constant 0 : index
    %c0_4 = arith.constant 0 : index
    %3 = vector.load %arg3[%c0_3, %c0_4] : memref<1x128xf32, #tpu.memory_space<vmem>>, vector<1x128xf32>
    %4 = vector.broadcast %3 : vector<1x128xf32> to vector<16x128xf32>
    %5 = arith.addf %2, %4 : vector<16x128xf32>
    %c0_5 = arith.constant 0 : index
    %c0_6 = arith.constant 0 : index
    %6 = vector.load %arg6[%c0_5, %c0_6] : memref<16x128xf32, #tpu.memory_space<vmem>>, vector<16x128xf32>
    tpu.vector_store %arg6[%c0_5, %c0_6], %5 {strides = array<i32>} : memref<16x128xf32, #tpu.memory_space<vmem>>, vector<16x128xf32>,
    %7 = arith.truncf %5 : vector<16x128xf32> to vector<16x128xbf16>
    %c0_7 = arith.constant 0 : index
    %c0_8 = arith.constant 0 : index
    %8 = vector.load %arg4[%c0_7, %c0_8] : memref<128x128xbf16, #tpu.memory_space<vmem>>, vector<128x128xbf16>
    %cst_9 = arith.constant dense<0.000000e+00> : vector<16x128xf32>
    %9 = tpu.matmul %7, %8, %cst_9 {dimension_numbers = #tpu.dot_dimension_numbers<[1], [0], [0], [1], [0, 0, 1, 1], [], []>} : vector<16x128xbf16>, vector<128x128xbf16>, vector<16x128xf32> -> vector<16x128xf32>
    %c0_10 = arith.constant 0 : index
    %c0_11 = arith.constant 0 : index
    %10 = vector.load %arg5[%c0_10, %c0_11] : memref<1x128xf32, #tpu.memory_space<vmem>>, vector<1x128xf32>
    %11 = vector.broadcast %10 : vector<1x128xf32> to vector<16x128xf32>
    %12 = arith.addf %9, %11 : vector<16x128xf32>
    %cst_12 = arith.constant 0.000000e+00 : f32
    %13 = vector.broadcast %cst_12 : f32 to vector<16x128xf32>
    %14 = arith.maximumf %12, %13 : vector<16x128xf32>
    %c0_13 = arith.constant 0 : index
    %c0_14 = arith.constant 0 : index
    %15 = vector.load %arg7[%c0_13, %c0_14] : memref<16x128xf32, #tpu.memory_space<vmem>>, vector<16x128xf32>
    tpu.vector_store %arg7[%c0_13, %c0_14], %14 {strides = array<i32>} : memref<16x128xf32, #tpu.memory_space<vmem>>, vector<16x128xf32>,
    return
  }
  func.func @transform_0(%arg0: i32) -> (i32, i32) {
    %c0_i32 = arith.constant 0 : i32
    %c0_i32_0 = arith.constant 0 : i32
    return %arg0, %c0_i32 : i32, i32
  }
  func.func @transform_1(%arg0: i32) -> (i32, i32) {
    %c0_i32 = arith.constant 0 : i32
    %c0_i32_0 = arith.constant 0 : i32
    %c0_i32_1 = arith.constant 0 : i32
    return %c0_i32, %c0_i32_0 : i32, i32
  }
  func.func @transform_2(%arg0: i32) -> (i32, i32) {
    %c0_i32 = arith.constant 0 : i32
    %c0_i32_0 = arith.constant 0 : i32
    %c0_i32_1 = arith.constant 0 : i32
    return %c0_i32, %c0_i32_0 : i32, i32
  }
  func.func @transform_3(%arg0: i32) -> (i32, i32) {
    %c0_i32 = arith.constant 0 : i32
    %c0_i32_0 = arith.constant 0 : i32
    %c0_i32_1 = arith.constant 0 : i32
    return %c0_i32, %c0_i32_0 : i32, i32
  }
  func.func @transform_4(%arg0: i32) -> (i32, i32) {
    %c0_i32 = arith.constant 0 : i32
    %c0_i32_0 = arith.constant 0 : i32
    %c0_i32_1 = arith.constant 0 : i32
    return %c0_i32, %c0_i32_0 : i32, i32
  }
  func.func @transform_5(%arg0: i32) -> (i32, i32) {
    %c0_i32 = arith.constant 0 : i32
    %c0_i32_0 = arith.constant 0 : i32
    return %arg0, %c0_i32 : i32, i32
  }
  func.func @transform_6(%arg0: i32) -> (i32, i32) {
    %c0_i32 = arith.constant 0 : i32
    %c0_i32_0 = arith.constant 0 : i32
    return %arg0, %c0_i32 : i32, i32
  }
}

</mosaic_0001>

<bundles_post_ra>
// kernel: _forward_with_context.1
= control target key start
LH: loop header
LB: loop body
LE: loop exit
PB: predicated region body
PF: predicated region fallthrough
CT: control target
= control target key end

     0   :  { %12 = vsyncpa [#allocation3], 0  ;;  %s452_s0 = inlined_call_operand.vmem [shape: bf16[16,128], index: 0, kind: input, shape index: {}]   ;;  %s453_s1 = inlined_call_operand.hbm [shape: bf16[128,128], index: 1, kind: input, shape index: {}]   ;;  %s454_s2 = inlined_call_operand.vmem [shape: f32[1,128], index: 2, kind: input, shape index: {}]   ;;  %s455_s3 = inlined_call_operand.hbm [shape: bf16[128,128], index: 3, kind: input, shape index: {}]   ;;  %s456_s4 = inlined_call_operand.vmem [shape: f32[1,128], index: 4, kind: input, shape index: {}]   ;;  %s457_s5 = inlined_call_operand.vmem [shape: f32[16,128], index: 5, kind: output, shape index: {0}]   ;;  %s458_s6 = inlined_call_operand.vmem [shape: f32[16,128], index: 6, kind: output, shape index: {1}]  }
   0x1   :  { %s20_s23 = sshll.u32 %s453_s1, 4  ;;  %s21_s23 = int_to_ptr.hbm [resolvable:$true] %s20_s23 }
   0x2   :  { %13 = vsyncpa [#allocation5], 0  ;;  %s386_s24 = smov [#allocation2]   ;;  %s35_s28 = sshll.u32 %s455_s3, 4  ;;  %s36_s28 = int_to_ptr.hbm [resolvable:$true] %s35_s28 }
   0x3   :  { %s22_s25 = sshll.u32 %s386_s24, 4  ;;  %s387_s29 = smov 64   ;;  %s23_s25 = int_to_ptr.vmem [resolvable:$true] %s22_s25 }
   0x4   :  { %s388_s30 = smov 4   ;;  %s389_s7 = smov [#allocation4]  }
   0x5   :  { %28 = dma.hbm_to_vmem [thread:$0]  %s21_s23, 1024, %s23_s25, [#allocation3], %s387_s29, %s387_s29, %s388_s30  }
   0x6   :  { %s37_s8 = sshll.u32 %s389_s7, 4  ;;  %s38_s8 = int_to_ptr.vmem [resolvable:$true] %s37_s8 }
   0x7   :  { %43 = dma.hbm_to_vmem [thread:$0]  %s36_s28, 1024, %s38_s8, [#allocation5], %s387_s29, %s387_s29, %s388_s30  }
   0x8   :  { %382 = dma.done.wait [#allocation3], 1024  }
   0x9   :  { %383 = vsyncadd [#allocation3], 4294966272 }
   0xa   :  { %384 = dma.done.wait [#allocation5], 1024  }
   0xb   :  { %385 = vsyncadd [#allocation5], 4294966272  ;;  %v319_v0 = vld [vmem:[#allocation2 + $0x38] sm:$0xff]  ;;  %v318_v1 = vld [vmem:[#allocation2 + $0x30] sm:$0xff] }
   0xc   :  { %130 = vmatpush.bf16.msra.mxu0 %v319_v0  ;;  %v327_v2 = vld [vmem:[#allocation4 + $0x38] sm:$0xff]  ;;  %v326_v3 = vld [vmem:[#allocation4 + $0x30] sm:$0xff]  ;;  %v317_v4 = vld [vmem:[#allocation2 + $0x28] sm:$0xff] }
   0xd   :  { %215 = vmatpush.bf16.msra.mxu1 %v327_v2  ;;  %v325_v5 = vld [vmem:[#allocation4 + $0x28] sm:$0xff]  ;;  %v316_v6 = vld [vmem:[#allocation2 + $0x20] sm:$0xff]  ;;  %v315_v8 = vld [vmem:[#allocation2 + $0x18] sm:$0xff] }
   0xe   :  { %v324_v7 = vld [vmem:[#allocation4 + $0x20] sm:$0xff]  ;;  %v323_v9 = vld [vmem:[#allocation4 + $0x18] sm:$0xff]  ;;  %v314_v10 = vld [vmem:[#allocation2 + $0x10] sm:$0xff] }
   0xf   :  { %v313_v11 = vld [vmem:[#allocation2 + $0x8] sm:$0xff]  ;;  %v312_v12 = vld [vmem:[#allocation2] sm:$0xff]  ;;  %v322_v14 = vld [vmem:[#allocation4 + $0x10] sm:$0xff] }
  0x10   :  { %131 = vmatpush.bf16.msra.mxu0 %v318_v1  ;;  %v311_v13 = vld [vmem:[%s452_s0] sm:$0xff]  ;;  %v321_v15 = vld [vmem:[#allocation4 + $0x8] sm:$0xff] }
  0x11   :  { %216 = vmatpush.bf16.msra.mxu1 %v326_v3  ;;  %v320_v16 = vld [vmem:[#allocation4] sm:$0xff] }
  0x12   :  { %v332_v17 = vld [vmem:[%s454_s2] ss:$0 sm:$0xff] }
  0x13   :  { %v333_v23 = vld [vmem:[%s456_s4] ss:$0 sm:$0xff] }
  0x14   :  { %132 = vmatpush.bf16.msra.mxu0 %v317_v4 }
  0x15   :  { %217 = vmatpush.bf16.msra.mxu1 %v325_v5 }
  0x18   :  { %133 = vmatpush.bf16.msra.mxu0 %v316_v6 }
  0x19   :  { %218 = vmatpush.bf16.msra.mxu1 %v324_v7 }
  0x1c   :  { %134 = vmatpush.bf16.msra.mxu0 %v315_v8 }
  0x1d   :  { %219 = vmatpush.bf16.msra.mxu1 %v323_v9 }
  0x20   :  { %135 = vmatpush.bf16.msra.mxu0 %v314_v10 }
  0x21   :  { %220 = vmatpush.bf16.msra.mxu1 %v322_v14 }
  0x24   :  { %136 = vmatpush.bf16.msra.mxu0 %v313_v11 }
  0x25   :  { %221 = vmatpush.bf16.msra.mxu1 %v321_v15 }
  0x28   :  { %137 = vmatpush.bf16.msra.mxu0 %v312_v12 }
  0x29   :  { %222 = vmatpush.bf16.msra.mxu1 %v320_v16 }
  0x2b   :  { %138 = vmatmul.bf16.vlgmr.msra.gmra.mxu0 %v311_v13 }
  0xa8   :  { %v139_v18 = vpop.f32.mrf.mxu0 }
  0xa9   :  { %v140_v19 = vadd.f32 %v332_v17, %v139_v18 }
  0xab   :  { %144 = vst [vmem:[%s457_s5] sm:$0xff] %v140_v19 }
  0xb0   :  { %v141_v20 = vpop.f32.mrf.mxu0 }
  0xb1   :  { %v142_v21 = vadd.f32 %v332_v17, %v141_v20 }
  0xb3   :  { %145 = vst [vmem:[%s457_s5 + $0x8] sm:$0xff] %v142_v21  ;;  %v146_v22 = vpack.c.bf16 %v142_v21, %v140_v19 }
  0xb5   :  { %223 = vmatmul.bf16.vlgmr.msra.gmra.mxu1 %v146_v22 }
 0x132   :  { %v224_v24 = vpop.f32.mrf.mxu1 }
 0x133   :  { %v225_v25 = vadd.f32 %v333_v23, %v224_v24 }
 0x135   :  { %v229_v26 = vmax.f32 %v225_v25, 0.0 }
 0x137   :  { %231 = vst [vmem:[%s458_s6] sm:$0xff] %v229_v26 }
 0x13a   :  { %v226_v27 = vpop.f32.mrf.mxu1 }
 0x13b   :  { %v227_v28 = vadd.f32 %v333_v23, %v226_v27 }
 0x13d   :  { %v230_v29 = vmax.f32 %v227_v28, 0.0 }
 0x13f   :  { %232 = vst [vmem:[%s458_s6 + $0x8] sm:$0xff] %v230_v29 }
 0x140   :  { %241 = vsyncpa [#allocation3], 1 }
 0x141   :  { %242 = vsyncpa [#allocation5], 1 }

</bundles_post_ra>
